<compile_context>
chip_gen: v5e
topology: v5e:2x2
jax: 0.10.0
libtpu: 0.0.40
codegen_flags: <defaults>
</compile_context>

<pallas_src>
import math

import jax
import jax.numpy as jnp
from jax import lax
from jax.experimental import pallas as pl
from jax.experimental.pallas import tpu as pltpu


def _round_up(v: int, a: int) -> int:
    return ((v + a - 1) // a) * a


def _make_aam_kernel(m: float, s: float, tn_block: int):
    cos_m = math.cos(m)
    sin_m = math.sin(m)
    th = math.cos(math.pi - m)
    mm = math.sin(math.pi - m) * m
    inv_s = 1.0 / s

    def kernel(xs_ref, wn_ref, label_ref, out_ref):
        # xs = s * normalize(x) (pre-scaled in the wrapper: MXU applies the scale for free)
        # wn = normalize(weight)
        scaled_cos = lax.dot_general(
            xs_ref[...], wn_ref[...],
            dimension_numbers=(((1,), (1,)), ((), ())),
            preferred_element_type=jnp.float32,
        )                                             # [TM, TN] == s * cosine (f32)
        label = label_ref[...]                        # [TM, 1] int32 (-1 for padded rows)

        tm, tn = scaled_cos.shape
        col0 = pl.program_id(1) * tn_block
        class_ids = col0 + lax.broadcasted_iota(jnp.int32, (tm, tn), 1)
        is_target = class_ids == label                # [TM, TN]

        # Angular-margin math only on the target column: masked lane-reduce -> [TM, 1].
        cos_t = jnp.sum(jnp.where(is_target, scaled_cos, 0.0),
                        axis=-1, keepdims=True) * inv_s
        sin_t = jnp.sqrt(jnp.clip(1.0 - cos_t * cos_t, 0.0, 1.0))
        phi_t = cos_t * cos_m - sin_t * sin_m
        phi_t = jnp.where(cos_t - th > 0, phi_t, cos_t - mm)

        # Full-tile epilogue: a single select + cast (scale already folded in).
        out_ref[...] = jnp.where(is_target, phi_t * s, scaled_cos).astype(out_ref.dtype)

    return kernel


def _select_tiles(B, C, D, mm_itemsize, out_itemsize, block_b, block_c):
    # --- batch tile: keep the whole batch in one i-tile when possible --------------
    if B <= block_b:
        tm = B                                     # full extent (no batch padding)
    else:
        tm = max(8, (block_b // 8) * 8)            # 8-aligned sublane tile
    Bp = pl.cdiv(B, tm) * tm

    # --- class tile: adaptive to D so each weight-tile DMA is ~>=1 MiB -------------
    if block_c is None:
        tn = -(-(1 << 20) // max(D * mm_itemsize, 1))      # rows per ~1 MiB
        tn = min(2048, max(512, _round_up(tn, 128)))
    else:
        tn = block_c
    if tn >= C:
        tn = C                                     # full extent (no class padding)
    else:
        tn = _round_up(tn, 128)                    # lane/sublane alignment when tiled
    Cp = pl.cdiv(C, tn) * tn

    # --- guarantee >=2 grid tiles when the problem allows (v7x has 2 TensorCores) ---
    if (Bp // tm) * (Cp // tn) < 2 and C >= 256:
        tn = max(128, _round_up(pl.cdiv(C, 2), 128))
        Cp = pl.cdiv(C, tn) * tn

    # --- VMEM budget (double-buffered x, w, out, labels), safe for v7x's 64 MiB -----
    def need(tm_, tn_):
        return 2 * (tm_ * D * mm_itemsize + tn_ * D * mm_itemsize
                    + tm_ * tn_ * out_itemsize + tm_ * 4)

    budget = 40 << 20
    while need(tm, tn) > budget and tn > 256:
        tn = max(256, _round_up(max(128, tn // 2), 128))
        Cp = pl.cdiv(C, tn) * tn
    while need(tm, tn) > budget and tm > 128:
        tm = max(128, ((tm // 2) // 8) * 8)
        Bp = pl.cdiv(B, tm) * tm

    return tm, tn, Bp, Cp, need(tm, tn)


def aam_softmax_forward(x, weight, label, *, m: float, s: float,
                        block_b: int = 512, block_c: int | None = None,
                        matmul_dtype=jnp.bfloat16, out_dtype=None):
    """x: [B, D], weight: [C, D], label: [B] int -> logits [B, C] (AAMsoftmax forward).

    matmul_dtype=jnp.bfloat16 (default) halves the streamed HBM bytes and uses the fast
    bf16 MXU path (f32 accumulation); pass matmul_dtype=None for an f32-exact stream.
    """
    B, D = x.shape
    C, D2 = weight.shape
    assert D == D2
    if out_dtype is None:
        out_dtype = x.dtype

    # ---- wrapper-side preprocessing: normalize once, fold the scale, cast ----------
    # F.normalize(v, dim=1): v / max(||v||, eps)  ==  v * rsqrt(max(||v||^2, eps^2))
    eps = 1e-12
    xf = x.astype(jnp.float32)
    wf = weight.astype(jnp.float32)
    xs = xf * (lax.rsqrt(jnp.maximum(jnp.sum(xf * xf, axis=-1, keepdims=True),
                                     eps * eps)) * s)
    wn = wf * lax.rsqrt(jnp.maximum(jnp.sum(wf * wf, axis=-1, keepdims=True), eps * eps))
    if matmul_dtype is not None:
        xs = xs.astype(matmul_dtype)
        wn = wn.astype(matmul_dtype)
    mm_itemsize = jnp.dtype(xs.dtype).itemsize
    out_itemsize = jnp.dtype(out_dtype).itemsize

    tm, tn, Bp, Cp, vmem_need = _select_tiles(
        B, C, D, mm_itemsize, out_itemsize, block_b, block_c)

    label2d = label.reshape(B, 1).astype(jnp.int32)
    if Bp != B:
        xs = jnp.pad(xs, ((0, Bp - B), (0, 0)))
        label2d = jnp.pad(label2d, ((0, Bp - B), (0, 0)), constant_values=-1)
    if Cp != C:
        wn = jnp.pad(wn, ((0, Cp - C), (0, 0)))

    vmem_limit = int(min(64 << 20, max(vmem_need + (8 << 20), 16 << 20)))

    kernel = _make_aam_kernel(m, s, tn)
    out = pl.pallas_call(
        kernel,
        out_shape=jax.ShapeDtypeStruct((Bp, Cp), out_dtype),
        grid_spec=pltpu.PrefetchScalarGridSpec(
            num_scalar_prefetch=0,
            grid=(Bp // tm, Cp // tn),
            in_specs=[
                pl.BlockSpec((tm, D), lambda i, j: (i, 0)),   # s * normalize(x)
                pl.BlockSpec((tn, D), lambda i, j: (j, 0)),   # normalize(weight) (streamed)
                pl.BlockSpec((tm, 1), lambda i, j: (i, 0)),   # labels
            ],
            out_specs=pl.BlockSpec((tm, tn), lambda i, j: (i, j)),
        ),
        compiler_params=pltpu.CompilerParams(
            dimension_semantics=("parallel", "parallel"),
            vmem_limit_bytes=vmem_limit),
    )(xs, wn, label2d)

    if Bp != B or Cp != C:
        out = out[:B, :C]
    return out


def aam_softmax_reference(x, weight, label, *, m: float, s: float):
    """Pure-JAX reference matching the PyTorch forward."""
    eps = 1e-12
    xn = x / jnp.maximum(jnp.linalg.norm(x, axis=-1, keepdims=True), eps)
    wn = weight / jnp.maximum(jnp.linalg.norm(weight, axis=-1, keepdims=True), eps)
    cosine = xn @ wn.T
    sine = jnp.sqrt(jnp.clip(1.0 - cosine * cosine, 0.0, 1.0))
    cos_m, sin_m = math.cos(m), math.sin(m)
    th, mm = math.cos(math.pi - m), math.sin(math.pi - m) * m
    phi = cosine * cos_m - sine * sin_m
    phi = jnp.where(cosine - th > 0, phi, cosine - mm)
    one_hot = jax.nn.one_hot(label, cosine.shape[1], dtype=cosine.dtype)
    return (one_hot * phi + (1.0 - one_hot) * cosine) * s


if __name__ == "__main__":
    m, s = 0.2, 30.0             # margin, scale (module __init__ args)

    # --- test 1: small shapes, single-tile path, f32 stream (bit-faithful-ish) ------
    kx, kw, kl = jax.random.split(jax.random.PRNGKey(0), 3)
    B, D, C = 8, 32, 16
    x = jax.random.normal(kx, (B, D), dtype=jnp.float32)
    weight = jax.random.normal(kw, (C, D), dtype=jnp.float32)
    label = jax.random.randint(kl, (B,), 0, C, dtype=jnp.int32)

    out = jax.block_until_ready(
        aam_softmax_forward(x, weight, label, m=m, s=s, matmul_dtype=None))
    ref = aam_softmax_reference(x, weight, label, m=m, s=s)
    assert out.shape == (B, C)
    assert jnp.allclose(out, ref, atol=1e-4, rtol=1e-4), "mismatch vs reference (small)"

    # --- test 2: exercise tiled (B, C) grid + padding + class-id offset, f32 stream --
    kx2, kw2, kl2 = jax.random.split(jax.random.PRNGKey(1), 3)
    B2, D2, C2 = 24, 64, 200
    x2 = jax.random.normal(kx2, (B2, D2), dtype=jnp.float32)
    w2 = jax.random.normal(kw2, (C2, D2), dtype=jnp.float32)
    l2 = jax.random.randint(kl2, (B2,), 0, C2, dtype=jnp.int32)

    out2 = jax.block_until_ready(
        aam_softmax_forward(x2, w2, l2, m=m, s=s,
                            block_b=8, block_c=128, matmul_dtype=None))
    ref2 = aam_softmax_reference(x2, w2, l2, m=m, s=s)
    assert out2.shape == (B2, C2)
    assert jnp.allclose(out2, ref2, atol=1e-4, rtol=1e-4), "mismatch vs reference (tiled)"

    # --- test 3: default config (bf16 stream, adaptive TN, megacore class split) ----
    kx3, kw3, kl3 = jax.random.split(jax.random.PRNGKey(2), 3)
    B3, D3, C3 = 16, 192, 400
    x3 = jax.random.normal(kx3, (B3, D3), dtype=jnp.float32)
    w3 = jax.random.normal(kw3, (C3, D3), dtype=jnp.float32)
    l3 = jax.random.randint(kl3, (B3,), 0, C3, dtype=jnp.int32)

    out3 = jax.block_until_ready(aam_softmax_forward(x3, w3, l3, m=m, s=s))
    ref3 = aam_softmax_reference(x3, w3, l3, m=m, s=s)
    assert out3.shape == (B3, C3)
    # bf16 operand stream (f32 accumulation) -> ~1e-2-level cosine precision.
    assert jnp.allclose(out3, ref3, atol=0.2, rtol=3e-2), "mismatch vs reference (bf16)"

    print("KERNEL_OK")
</pallas_src>

<mosaic_0001>
module attributes {stable_mosaic.version = 11 : i64} {
  func.func @kernel(%arg0: i32, %arg1: i32, %arg2: memref<8x32xf32, #tpu.memory_space<vmem>>, %arg3: memref<16x32xf32, #tpu.memory_space<vmem>>, %arg4: memref<8x1xi32, #tpu.memory_space<vmem>>, %arg5: memref<8x16xf32, #tpu.memory_space<vmem>>) attributes {dimension_semantics = [#tpu.dimension_semantics<parallel>, #tpu.dimension_semantics<parallel>], iteration_bounds = array<i64: 1, 1>, scalar_prefetch = 0 : i64, scratch_operands = 0 : i64, tpu.core_type = #tpu.core_type<tc>, window_params = [{transform_indices = @transform_0, window_bounds = array<i64: 8, 32>}, {transform_indices = @transform_1, window_bounds = array<i64: 16, 32>}, {transform_indices = @transform_2, window_bounds = array<i64: 8, 1>}, {transform_indices = @transform_3, window_bounds = array<i64: 8, 16>}]} {
    %c0 = arith.constant 0 : index
    %c0_0 = arith.constant 0 : index
    %0 = vector.load %arg2[%c0, %c0_0] : memref<8x32xf32, #tpu.memory_space<vmem>>, vector<8x32xf32>
    %c0_1 = arith.constant 0 : index
    %c0_2 = arith.constant 0 : index
    %1 = vector.load %arg3[%c0_1, %c0_2] : memref<16x32xf32, #tpu.memory_space<vmem>>, vector<16x32xf32>
    %cst = arith.constant dense<0.000000e+00> : vector<8x16xf32>
    %2 = tpu.matmul %0, %1, %cst {dimension_numbers = #tpu.dot_dimension_numbers<[1], [1], [0], [0], [0, 0, 1, 0], [], []>} : vector<8x32xf32>, vector<16x32xf32>, vector<8x16xf32> -> vector<8x16xf32>
    %c0_3 = arith.constant 0 : index
    %c0_4 = arith.constant 0 : index
    %3 = vector.load %arg4[%c0_3, %c0_4] : memref<8x1xi32, #tpu.memory_space<vmem>>, vector<8x1xi32>
    %c16_i32 = arith.constant 16 : i32
    %4 = arith.muli %arg1, %c16_i32 : i32
    %5 = tpu.iota {dimensions = array<i32: 1>} : vector<8x16xi32>
    %6 = vector.broadcast %4 : i32 to vector<8x16xi32>
    %7 = arith.addi %6, %5 : vector<8x16xi32>
    %8 = vector.broadcast %3 : vector<8x1xi32> to vector<8x16xi32>
    %9 = arith.cmpi eq, %7, %8 : vector<8x16xi32>
    %cst_5 = arith.constant 0.000000e+00 : f32
    %10 = vector.broadcast %cst_5 : f32 to vector<8x16xf32>
    %11 = arith.select %9, %2, %10 : vector<8x16xi1>, vector<8x16xf32>
    %cst_6 = arith.constant dense<0.000000e+00> : vector<8xf32>
    %12 = vector.multi_reduction <add>, %11, %cst_6 [1] : vector<8x16xf32> to vector<8xf32>
    %13 = vector.shape_cast %12 : vector<8xf32> to vector<8x1xf32>
    %cst_7 = arith.constant 0.0333333351 : f32
    %14 = vector.broadcast %cst_7 : f32 to vector<8x1xf32>
    %15 = arith.mulf %13, %14 : vector<8x1xf32>
    %16 = arith.mulf %15, %15 : vector<8x1xf32>
    %cst_8 = arith.constant 1.000000e+00 : f32
    %17 = vector.broadcast %cst_8 : f32 to vector<8x1xf32>
    %18 = arith.subf %17, %16 : vector<8x1xf32>
    %cst_9 = arith.constant 0.000000e+00 : f32
    %cst_10 = arith.constant 1.000000e+00 : f32
    %19 = vector.broadcast %cst_9 : f32 to vector<8x1xf32>
    %20 = arith.maximumf %19, %18 : vector<8x1xf32>
    %21 = vector.broadcast %cst_10 : f32 to vector<8x1xf32>
    %22 = arith.minimumf %21, %20 : vector<8x1xf32>
    %23 = math.sqrt %22 : vector<8x1xf32>
    %cst_11 = arith.constant 0.980066597 : f32
    %24 = vector.broadcast %cst_11 : f32 to vector<8x1xf32>
    %25 = arith.mulf %15, %24 : vector<8x1xf32>
    %cst_12 = arith.constant 0.198669329 : f32
    %26 = vector.broadcast %cst_12 : f32 to vector<8x1xf32>
    %27 = arith.mulf %23, %26 : vector<8x1xf32>
    %28 = arith.subf %25, %27 : vector<8x1xf32>
    %cst_13 = arith.constant -0.980066597 : f32
    %29 = vector.broadcast %cst_13 : f32 to vector<8x1xf32>
    %30 = arith.subf %15, %29 : vector<8x1xf32>
    %cst_14 = arith.constant 0.000000e+00 : f32
    %31 = vector.broadcast %cst_14 : f32 to vector<8x1xf32>
    %32 = arith.cmpf ogt, %30, %31 : vector<8x1xf32>
    %cst_15 = arith.constant 0.0397338644 : f32
    %33 = vector.broadcast %cst_15 : f32 to vector<8x1xf32>
    %34 = arith.subf %15, %33 : vector<8x1xf32>
    %35 = arith.select %32, %28, %34 : vector<8x1xi1>, vector<8x1xf32>
    %cst_16 = arith.constant 3.000000e+01 : f32
    %36 = vector.broadcast %cst_16 : f32 to vector<8x1xf32>
    %37 = arith.mulf %35, %36 : vector<8x1xf32>
    %38 = vector.shape_cast %37 : vector<8x1xf32> to vector<8x1xf32>
    %39 = vector.broadcast %38 : vector<8x1xf32> to vector<8x16xf32>
    %40 = arith.select %9, %39, %2 : vector<8x16xi1>, vector<8x16xf32>
    %c0_17 = arith.constant 0 : index
    %c0_18 = arith.constant 0 : index
    %41 = vector.load %arg5[%c0_17, %c0_18] : memref<8x16xf32, #tpu.memory_space<vmem>>, vector<8x16xf32>
    tpu.vector_store %arg5[%c0_17, %c0_18], %40 {strides = array<i32>} : memref<8x16xf32, #tpu.memory_space<vmem>>, vector<8x16xf32>,
    return
  }
  func.func @transform_0(%arg0: i32, %arg1: i32) -> (i32, i32) {
    %c0_i32 = arith.constant 0 : i32
    %c0_i32_0 = arith.constant 0 : i32
    return %arg0, %c0_i32 : i32, i32
  }
  func.func @transform_1(%arg0: i32, %arg1: i32) -> (i32, i32) {
    %c0_i32 = arith.constant 0 : i32
    %c0_i32_0 = arith.constant 0 : i32
    return %arg1, %c0_i32 : i32, i32
  }
  func.func @transform_2(%arg0: i32, %arg1: i32) -> (i32, i32) {
    %c0_i32 = arith.constant 0 : i32
    %c0_i32_0 = arith.constant 0 : i32
    return %arg0, %c0_i32 : i32, i32
  }
  func.func @transform_3(%arg0: i32, %arg1: i32) -> (i32, i32) {
    %c0_i32 = arith.constant 0 : i32
    return %arg0, %arg1 : i32, i32
  }
}

</mosaic_0001>

<bundles_post_ra>
// kernel: tpu_custom_call.1
= control target key start
LH: loop header
LB: loop body
LE: loop exit
PB: predicated region body
PF: predicated region fallthrough
CT: control target
= control target key end

     0   :  { %8 = vsyncpa [#allocation3], 0  ;;  %s229_s0 = inlined_call_operand.vmem [shape: f32[8,32], index: 0, kind: input, shape index: {}]   ;;  %s230_s1 = inlined_call_operand.hbm [shape: f32[16,32], index: 1, kind: input, shape index: {}]   ;;  %s231_s2 = inlined_call_operand.vmem [shape: s32[8,1], index: 2, kind: input, shape index: {}]   ;;  %s232_s3 = inlined_call_operand.hbm [shape: f32[8,16], index: 3, kind: output, shape index: {}]  }
   0x1   :  { %9 = vsyncpa [#allocation4], 0  ;;  %s16_s14 = sshll.u32 %s230_s1, 4  ;;  %s188_s15 = smov [#allocation2]   ;;  %s17_s14 = int_to_ptr.hbm [resolvable:$true] %s16_s14 }
   0x2   :  { %s18_s16 = sshll.u32 %s188_s15, 4  ;;  %s189_s17 = smov 128   ;;  %s19_s16 = int_to_ptr.vmem [resolvable:$true] %s18_s16 }
   0x3   :  { %s190_s18 = smov 8  }
   0x4   :  { %24 = dma.hbm_to_vmem [thread:$0]  %s17_s14, 256, %s19_s16, [#allocation3], %s189_s17, %s189_s17, %s190_s18  }
   0x5   :  { %184 = dma.done.wait [#allocation3], 256  }
   0x6   :  { %185 = vsyncadd [#allocation3], 4294967040  ;;  %v191_v0 = vmov 0   ;;  %vm34_vm0 = vcmask 261120   ;;  %v33_v1 = vld [vmem:[#allocation2 + $0x8] sm:$0xff]  ;;  %v64_v2 = vld [vmem:[%s231_s2] sm:$0xff]  ;;  %v66_v5 = vlaneseq }
   0x7   :  { %133 = vset.pattern.permute.xlu0 %v191_v0  ;;  %123 = vmatpush.xpose.msk.msra.mxu0 %vm34_vm0, %v33_v1  ;;  %v32_v3 = vld [vmem:[#allocation2] sm:$0xff]  ;;  %vm75_vm2 = vcmask 130048   ;;  %s113_s24 = sshll.u32 %s232_s3, 4  ;;  %s114_s24 = int_to_ptr.hbm [resolvable:$true] %s113_s24 }
   0x8   :  { %71 = vperm.xlu0 %133, %v64_v2   ;;  %v31_v4 = vld [vmem:[%s229_s0] sm:$0xff]  ;;  %v67_v6 = vand.u32 127, %v66_v5  ;;  %s192_s0 = smov [#allocation5]  }
   0x9   :  { %s111_s2 = sshll.u32 %s192_s0, 4  ;;  %s112_s2 = int_to_ptr.vmem [resolvable:$true] %s111_s2 }
   0xb   :  { %124 = vmatpush.xpose.msk.msra.mxu0 %vm34_vm0, %v32_v3 }
   0xe   :  { %125 = vmatmul.msk.f32.vlgmr.msra.gmra.mxu0 %vm34_vm0, %v31_v4 }
  0x7a   :  { %v72_v7 = vpop.permute.xlu0 %71 }
  0x7b   :  { %vm73_vm1 = vcmp.eq.s32.totalorder %v67_v6, %v72_v7 }
  0x8b   :  { %v61_v8 = vpop.f32.mrf.mxu0 }
  0x8c   :  { %v74_v9 = vsel %vm73_vm1, %v61_v8, 0.0 }
  0x8d   :  { %v76_v10 = vsel %vm75_vm2, %v74_v9, 0.0 }
  0x8e   :  { %77 = vadd.xlane.f32.xlu0 %v76_v10 }
 0x101   :  { %v78_v11 = vpop.xlane.xlu0 %77 }
 0x102   :  { %v79_v12 = vmul.f32 0.033333335, %v78_v11 }
 0x104   :  { %v80_v13 = vmul.f32 %v79_v12, %v79_v12  ;;  %v126_v27 = vadd.f32 0.9800666, %v79_v12  ;;  %v96_v28 = vmul.f32 0.9800666, %v79_v12  ;;  %v127_v31 = vadd.f32 -0.039733864, %v79_v12 }
 0x106   :  { %v81_v14 = vsub.f32 1.0, %v80_v13  ;;  %vm100_vm5 = vcmp.gt.f32.partialorder %v126_v27, 0.0 }
 0x108   :  { %v82_v15 = vmax.f32 %v81_v14, 0.0 }
 0x10a   :  { %v83_v16 = vmin.f32 %v82_v15, 1.0 }
 0x10c   :  { %134 = vrsqrt.f32 %v83_v16  ;;  %vm91_vm3 = vcmp.eq.f32.partialorder %v83_v16, inf  ;;  %v94_v24 = vand.u32 2147483648, %v83_v16  ;;  %vm93_vm4 = vcmp.eq.f32.partialorder %v83_v16, 0.0 }
 0x112   :  { %v135_v17 = vpop.eup %134 }
 0x113   :  { %v85_v18 = vmul.f32 %v135_v17, %v83_v16 }
 0x115   :  { %v86_v19 = vmul.f32 %v135_v17, %v85_v18 }
 0x117   :  { %v87_v20 = vmul.f32 0.5, %v86_v19 }
 0x119   :  { %v88_v21 = vsub.f32 1.5, %v87_v20 }
 0x11b   :  { %v89_v22 = vmul.f32 %v135_v17, %v88_v21 }
 0x11d   :  { %v90_v23 = vmul.f32 %v89_v22, %v83_v16 }
 0x11f   :  { %v92_v25 = vsel %vm91_vm3, %v83_v16, %v90_v23 }
 0x120   :  { %v95_v26 = vsel %vm93_vm4, %v94_v24, %v92_v25 }
 0x121   :  { %v97_v29 = vmul.f32 0.19866933, %v95_v26 }
 0x123   :  { %v98_v30 = vsub.f32 %v96_v28, %v97_v29 }
 0x125   :  { %v102_v32 = vsel %vm100_vm5, %v98_v30, %v127_v31 }
 0x126   :  { %v103_v33 = vmul.f32 30.0, %v102_v32 }
 0x128   :  { %v104_v34 = vsel %vm73_vm1, %v103_v33, %v61_v8 }
 0x129   :  { %105 = vst.msk [vmem:[#allocation5] sm:$0xff] %vm75_vm2, %v104_v34 }
 0x12a   :  { %116 = dma.vmem_to_hbm [thread:$0]  %s112_s2, 128, %s114_s24, [#allocation4]  }
 0x12b   :  { %186 = dma.done.wait [#allocation4], 128  }
 0x12c   :  { %187 = vsyncadd [#allocation4], 4294967168 }
 0x12d   :  { %121 = vsyncpa [#allocation3], 1 }
 0x12e   :  { %122 = vsyncpa [#allocation4], 1 }

</bundles_post_ra>
